<compile_context>
chip_gen: v7x
topology: tpu7x:2x2x1
jax: 0.10.0
libtpu: 0.0.40
codegen_flags: <defaults>
</compile_context>

<pallas_src>
import numpy as np
import jax
import jax.numpy as jnp
from jax import lax
from jax.experimental import pallas as pl
from jax.experimental.pallas import tpu as pltpu


def _cdiv(a, b):
    return -(-a // b)


def _round_up(x, m):
    return ((x + m - 1) // m) * m


def _multi_tensorcore():
    """Best-effort: True where one device hosts two TensorCores (v4/v5p
    megacore, v7x) — only there do 'parallel' grid axes actually shard."""
    try:
        kind = jax.devices()[0].device_kind.lower()
    except Exception:
        return False
    return any(tag in kind for tag in ("v4", "v5p", "v7"))


def _vmem_capacity_bytes():
    try:
        return int(pltpu.get_tpu_info().vmem_capacity_bytes)
    except Exception:
        return 64 << 20                      # conservative (v7x per-core)


def _make_dice_kernel(tr, ts, sub, s_per_chunk, S):
    """Streams (tr, ts) blocks of logits/gt and accumulates per-(chunk, row)
    partial sums of {intersection, pred, gt}, lane-folded to width 128."""
    n_sub = ts // sub            # inner sub-chunks per DMA block
    n_fold = sub // 128          # 128-lane VALU folds per sub-chunk
    unroll = int(min(8, n_sub))

    def kernel(p_ref, g_ref, i_ref, ps_ref, gs_ref):
        c = pl.program_id(1)
        s = pl.program_id(2)

        # Zero the resident accumulators at the start of every (row, chunk)
        # group; the innermost grid axis is the spatial reduction.
        @pl.when(s == 0)
        def _init():
            i_ref[...] = jnp.zeros_like(i_ref)
            ps_ref[...] = jnp.zeros_like(ps_ref)
            gs_ref[...] = jnp.zeros_like(gs_ref)

        # Global spatial element offset of this tile.  Overhang tiles from
        # chunk rounding have tile_start >= S (their DMA is clamped to the
        # last in-bounds block by the index_map) and are fully masked here.
        tile_start = (c * s_per_chunk + s) * ts
        valid = S - tile_start                      # traced int32 scalar

        def accumulate(masked):
            def sub_body(j, carry):
                fi, fp, fg = carry
                off = pl.multiple_of(j * sub, sub)  # 128-aligned lane offset
                logits = p_ref[:, pl.ds(off, sub)]  # native dtype
                g = g_ref[:, pl.ds(off, sub)].astype(jnp.float32)
                # sigmoid(x) >= 0.5  <=>  x >= 0: pure-VPU sign test.
                pm = logits >= 0
                if masked:
                    lane = lax.broadcasted_iota(jnp.int32, (tr, sub), 1)
                    lm = lane < (valid - off)
                    pm = jnp.logical_and(pm, lm)
                    g = jnp.where(lm, g, 0.0)
                inter = jnp.where(pm, g, 0.0)       # == pred * gt
                pred = jnp.where(pm, 1.0, 0.0)
                # Lane fold (tr, sub) -> (tr, 128) with 128-aligned static
                # slices: VALU adds only, no per-step XLU cross-lane reduce.
                for k in range(n_fold):
                    sl = slice(k * 128, (k + 1) * 128)
                    fi = fi + inter[:, sl]
                    fp = fp + pred[:, sl]
                    fg = fg + g[:, sl]
                return fi, fp, fg

            z = jnp.zeros((tr, 128), jnp.float32)
            fi, fp, fg = lax.fori_loop(0, n_sub, sub_body, (z, z, z),
                                       unroll=unroll)
            i_ref[0] += fi
            ps_ref[0] += fp
            gs_ref[0] += fg

        @pl.when(valid >= ts)        # common case: fully in-bounds tile
        def _full():
            accumulate(False)

        @pl.when(valid < ts)         # ragged / overhang tile: mask lanes
        def _ragged():
            accumulate(True)

    return kernel


def dice_metric(predict, gt, activation='sigmoid', is_average=True, *,
                tile_rows=None, tile_s=None, spatial_chunks=None):
    """Pallas implementation of DiceMetric(dims=[2,3,4]).forward (sigmoid)."""
    if activation != 'sigmoid':
        # TODO(synk): softmax-over-channel activation path not implemented in-kernel.
        raise NotImplementedError("only activation='sigmoid' is implemented")

    N, C = predict.shape[0], predict.shape[1]
    S = int(np.prod(predict.shape[2:]))
    NC = N * C

    # Free (contiguous) reshapes only: rows = (batch, channel) pairs, lanes =
    # flattened reduction dims [2, 3, 4].  No padding, no dtype casts — the
    # only HBM traffic is a single streaming read of each input.
    p2 = jnp.reshape(predict, (NC, S))
    g2 = jnp.reshape(gt, (NC, S))

    p_item = jnp.dtype(p2.dtype).itemsize
    g_item = jnp.dtype(g2.dtype).itemsize
    max_item = max(p_item, g_item)

    # Generation-aware per-input block-byte target (amortize per-step cost).
    vmem_cap = _vmem_capacity_bytes()
    block_target = (8 << 20) if vmem_cap >= (96 << 20) else (4 << 20)

    # Row tile: multiple of the sublane packing of the narrowest dtype.
    sub_mult = 8 * (4 // min(p_item, g_item, 4))

    # Spatial (lane) tile from the block budget, capped by the extent.
    ts_budget = max(128, (block_target // (sub_mult * max_item)) // 128 * 128)
    ts_cap = _round_up(S, 128)
    if tile_s is None:
        ts = min(ts_budget, ts_cap)
    else:
        ts = min(max(128, _round_up(int(tile_s), 128)), ts_cap)

    # If S alone can't reach the block target, grow the row tile instead
    # (fewer grid steps at identical HBM traffic); cap at 64 rows to keep the
    # in-kernel vreg working set bounded.
    if tile_rows is None:
        tr = sub_mult
        if ts < ts_budget:
            tr_budget = (block_target // (ts * max_item)) // sub_mult * sub_mult
            tr = int(max(sub_mult, min(tr_budget, _round_up(NC, sub_mult), 64)))
    else:
        tr = _round_up(int(tile_rows), sub_mult)

    # Lane sub-chunk per inner-loop iteration: bounds the f32 intermediates so
    # VMEM holds only the double-buffered DMA blocks, independent of ts.
    sub_target = max(128, ((4096 // tr) // 128) * 128)
    sub = min(sub_target, ts)
    ts = _round_up(ts, sub)                       # ts divisible by sub

    row_tiles = _cdiv(NC, tr)
    s_tiles_total = _cdiv(S, ts)

    # Spatial chunking ("parallel" axis) only pays on 2-TensorCore parts, and
    # only when the row tiling alone would leave one core idle.
    if spatial_chunks is not None:
        n_chunks = max(1, min(int(spatial_chunks), s_tiles_total))
    elif _multi_tensorcore() and s_tiles_total >= 2 and row_tiles % 2 == 1:
        n_chunks = 2
    else:
        n_chunks = 1
    s_per_chunk = _cdiv(s_tiles_total, n_chunks)

    # VMEM: double-buffered input blocks + tiny accumulator blocks + margin,
    # capped at ~3/4 of physical VMEM to leave compiler-scratch headroom.
    needed = 2 * (tr * ts * (p_item + g_item) + 3 * tr * 128 * 4) + (8 << 20)
    vmem_limit = int(min(vmem_cap * 3 // 4, max(32 << 20, needed)))

    kernel = _make_dice_kernel(tr, ts, sub, s_per_chunk, S)

    def in_map(r, c, s):
        # Clamp overhang tiles (chunk rounding) to the last in-bounds block;
        # the kernel masks their contribution to zero.
        return (r, jnp.minimum(c * s_per_chunk + s, s_tiles_total - 1))

    def out_map(r, c, s):
        return (c, r, 0)

    # Lane-dense (last dim 128) partial-sum outputs; rows >= NC come from
    # partial row blocks (garbage) and are sliced off below.
    part = jax.ShapeDtypeStruct((n_chunks, row_tiles * tr, 128), jnp.float32)

    i_parts, p_parts, g_parts = pl.pallas_call(
        kernel,
        out_shape=(part, part, part),
        grid_spec=pltpu.PrefetchScalarGridSpec(
            num_scalar_prefetch=0,
            grid=(row_tiles, n_chunks, s_per_chunk),
            in_specs=[
                pl.BlockSpec((tr, ts), in_map),
                pl.BlockSpec((tr, ts), in_map),
            ],
            out_specs=[
                pl.BlockSpec((1, tr, 128), out_map),
                pl.BlockSpec((1, tr, 128), out_map),
                pl.BlockSpec((1, tr, 128), out_map),
            ],
        ),
        compiler_params=pltpu.CompilerParams(
            dimension_semantics=("parallel", "parallel", "arbitrary"),
            vmem_limit_bytes=vmem_limit),
    )(p2, g2)

    # Tiny finalize in JAX: fold chunks + lanes, drop garbage rows, dice.
    inter = jnp.sum(i_parts[:, :NC, :], axis=(0, 2))
    psum = jnp.sum(p_parts[:, :NC, :], axis=(0, 2))
    gsum = jnp.sum(g_parts[:, :NC, :], axis=(0, 2))
    dice = (2.0 * inter + 1e-05) / (psum + gsum + 1e-05)
    dice_nc = dice.reshape(N, C)
    return dice_nc.mean(0) if is_average else dice_nc.sum(0)


def _dice_reference(predict, gt, is_average=True):
    """Pure-JAX reference mirroring the PyTorch forward (sigmoid path)."""
    predict = predict.astype(jnp.float32)
    gt = gt.astype(jnp.float32)
    pred = jax.nn.sigmoid(predict)
    pred = jnp.where(pred < 0.5, 0.0, 1.0)
    dims = tuple(range(2, predict.ndim))
    inter = jnp.sum(pred * gt, axis=dims)
    union = jnp.sum(pred, axis=dims) + jnp.sum(gt, axis=dims)
    dice = (2.0 * inter + 1e-05) / (union + 1e-05)
    return dice.mean(0) if is_average else dice.sum(0)


if __name__ == "__main__":
    key = jax.random.PRNGKey(0)
    ks = jax.random.split(key, 10)

    def run_case(idx, shape, is_average=True, dtype=jnp.float32, **kw):
        p = jax.random.normal(ks[2 * idx], shape).astype(dtype)
        g = (jax.random.uniform(ks[2 * idx + 1], shape) > 0.5).astype(jnp.float32)
        out = jax.block_until_ready(
            dice_metric(p, g, is_average=is_average, **kw))
        ref = _dice_reference(p, g, is_average=is_average)
        np.testing.assert_allclose(np.asarray(out), np.asarray(ref),
                                   rtol=1e-5, atol=1e-5)

    # A: aligned shape, auto tiling, single grid step.
    run_case(0, (2, 4, 4, 8, 8))
    # B: ragged rows (NC=3) + ragged lanes (S=231), no padding, batch sum.
    run_case(1, (1, 3, 3, 7, 11), is_average=False, tile_s=128)
    # C: multiple row tiles + accumulation across spatial tiles.
    run_case(2, (4, 4, 4, 8, 8), tile_rows=8, tile_s=128)
    # D: explicit spatial chunking with an overhang tile (3 tiles / 2 chunks).
    run_case(3, (2, 3, 3, 10, 10), tile_s=128, spatial_chunks=2)
    # E: bf16 logits streamed at native dtype (no wrapper upcast).
    run_case(4, (2, 2, 4, 8, 8), dtype=jnp.bfloat16)

    print("KERNEL_OK")
</pallas_src>

<mosaic_0001>
module attributes {stable_mosaic.version = 11 : i64} {
  func.func @kernel(%arg0: i32, %arg1: i32, %arg2: i32, %arg3: memref<8x256xf32, #tpu.memory_space<vmem>>, %arg4: memref<8x256xf32, #tpu.memory_space<vmem>>, %arg5: memref<1x8x128xf32, #tpu.memory_space<vmem>>, %arg6: memref<1x8x128xf32, #tpu.memory_space<vmem>>, %arg7: memref<1x8x128xf32, #tpu.memory_space<vmem>>) attributes {dimension_semantics = [#tpu.dimension_semantics<parallel>, #tpu.dimension_semantics<parallel>, #tpu.dimension_semantics<arbitrary>], iteration_bounds = array<i64: 1, 1, 1>, scalar_prefetch = 0 : i64, scratch_operands = 0 : i64, tpu.core_type = #tpu.core_type<tc>, window_params = [{transform_indices = @transform_0, window_bounds = array<i64: 8, 256>}, {transform_indices = @transform_1, window_bounds = array<i64: 8, 256>}, {transform_indices = @transform_2, window_bounds = array<i64: 1, 8, 128>}, {transform_indices = @transform_3, window_bounds = array<i64: 1, 8, 128>}, {transform_indices = @transform_4, window_bounds = array<i64: 1, 8, 128>}]} {
    %c0_i32 = arith.constant 0 : i32
    %0 = arith.cmpi eq, %arg2, %c0_i32 : i32
    %1 = arith.extui %0 : i1 to i32
    %c0_i32_0 = arith.constant 0 : i32
    %2 = arith.cmpi ne, %1, %c0_i32_0 : i32
    scf.if %2 {
      %cst = arith.constant 0.000000e+00 : f32
      %13 = vector.broadcast %cst : f32 to vector<1x8x128xf32>
      %c0 = arith.constant 0 : index
      %c0_6 = arith.constant 0 : index
      %c0_7 = arith.constant 0 : index
      %14 = vector.load %arg5[%c0, %c0_6, %c0_7] : memref<1x8x128xf32, #tpu.memory_space<vmem>>, vector<1x8x128xf32>
      tpu.vector_store %arg5[%c0, %c0_6, %c0_7], %13 {strides = array<i32>} : memref<1x8x128xf32, #tpu.memory_space<vmem>>, vector<1x8x128xf32>,
      %cst_8 = arith.constant 0.000000e+00 : f32
      %15 = vector.broadcast %cst_8 : f32 to vector<1x8x128xf32>
      %c0_9 = arith.constant 0 : index
      %c0_10 = arith.constant 0 : index
      %c0_11 = arith.constant 0 : index
      %16 = vector.load %arg6[%c0_9, %c0_10, %c0_11] : memref<1x8x128xf32, #tpu.memory_space<vmem>>, vector<1x8x128xf32>
      tpu.vector_store %arg6[%c0_9, %c0_10, %c0_11], %15 {strides = array<i32>} : memref<1x8x128xf32, #tpu.memory_space<vmem>>, vector<1x8x128xf32>,
      %cst_12 = arith.constant 0.000000e+00 : f32
      %17 = vector.broadcast %cst_12 : f32 to vector<1x8x128xf32>
      %c0_13 = arith.constant 0 : index
      %c0_14 = arith.constant 0 : index
      %c0_15 = arith.constant 0 : index
      %18 = vector.load %arg7[%c0_13, %c0_14, %c0_15] : memref<1x8x128xf32, #tpu.memory_space<vmem>>, vector<1x8x128xf32>
      tpu.vector_store %arg7[%c0_13, %c0_14, %c0_15], %17 {strides = array<i32>} : memref<1x8x128xf32, #tpu.memory_space<vmem>>, vector<1x8x128xf32>,
    } else {
    }
    %c1_i32 = arith.constant 1 : i32
    %3 = arith.muli %arg1, %c1_i32 : i32
    %4 = arith.addi %3, %arg2 : i32
    %c256_i32 = arith.constant 256 : i32
    %5 = arith.muli %4, %c256_i32 : i32
    %c256_i32_1 = arith.constant 256 : i32
    %6 = arith.subi %c256_i32_1, %5 : i32
    %c256_i32_2 = arith.constant 256 : i32
    %7 = arith.cmpi sge, %6, %c256_i32_2 : i32
    %8 = arith.extui %7 : i1 to i32
    %c0_i32_3 = arith.constant 0 : i32
    %9 = arith.cmpi ne, %8, %c0_i32_3 : i32
    scf.if %9 {
      %cst = arith.constant 0.000000e+00 : f32
      %13 = vector.broadcast %cst : f32 to vector<8x128xf32>
      %c0_i32_6 = arith.constant 0 : i32
      %c256_i32_7 = arith.constant 256 : i32
      %14 = arith.muli %c0_i32_6, %c256_i32_7 : i32
      %15 = tpu.assume_multiple %14, 256 : i32
      %c0 = arith.constant 0 : index
      %16 = arith.index_cast %15 : i32 to index
      %17 = vector.load %arg3[%c0, %16] : memref<8x256xf32, #tpu.memory_space<vmem>>, vector<8x256xf32>
      %c0_8 = arith.constant 0 : index
      %18 = arith.index_cast %15 : i32 to index
      %19 = vector.load %arg4[%c0_8, %18] : memref<8x256xf32, #tpu.memory_space<vmem>>, vector<8x256xf32>
      %cst_9 = arith.constant 0.000000e+00 : f32
      %20 = vector.broadcast %cst_9 : f32 to vector<8x256xf32>
      %21 = arith.cmpf oge, %17, %20 : vector<8x256xf32>
      %cst_10 = arith.constant 0.000000e+00 : f32
      %22 = vector.broadcast %cst_10 : f32 to vector<8x256xf32>
      %23 = arith.select %21, %19, %22 : vector<8x256xi1>, vector<8x256xf32>
      %cst_11 = arith.constant 1.000000e+00 : f32
      %cst_12 = arith.constant 0.000000e+00 : f32
      %24 = vector.broadcast %cst_11 : f32 to vector<8x256xf32>
      %25 = vector.broadcast %cst_12 : f32 to vector<8x256xf32>
      %26 = arith.select %21, %24, %25 : vector<8x256xi1>, vector<8x256xf32>
      %27 = vector.extract_strided_slice %23 {offsets = [0, 0], sizes = [8, 128], strides = [1, 1]} : vector<8x256xf32> to vector<8x128xf32>
      %28 = arith.addf %13, %27 : vector<8x128xf32>
      %29 = vector.extract_strided_slice %26 {offsets = [0, 0], sizes = [8, 128], strides = [1, 1]} : vector<8x256xf32> to vector<8x128xf32>
      %30 = arith.addf %13, %29 : vector<8x128xf32>
      %31 = vector.extract_strided_slice %19 {offsets = [0, 0], sizes = [8, 128], strides = [1, 1]} : vector<8x256xf32> to vector<8x128xf32>
      %32 = arith.addf %13, %31 : vector<8x128xf32>
      %33 = vector.extract_strided_slice %23 {offsets = [0, 128], sizes = [8, 128], strides = [1, 1]} : vector<8x256xf32> to vector<8x128xf32>
      %34 = arith.addf %28, %33 : vector<8x128xf32>
      %35 = vector.extract_strided_slice %26 {offsets = [0, 128], sizes = [8, 128], strides = [1, 1]} : vector<8x256xf32> to vector<8x128xf32>
      %36 = arith.addf %30, %35 : vector<8x128xf32>
      %37 = vector.extract_strided_slice %19 {offsets = [0, 128], sizes = [8, 128], strides = [1, 1]} : vector<8x256xf32> to vector<8x128xf32>
      %38 = arith.addf %32, %37 : vector<8x128xf32>
      %c1_i32_13 = arith.constant 1 : i32
      %c0_14 = arith.constant 0 : index
      %c0_15 = arith.constant 0 : index
      %c0_16 = arith.constant 0 : index
      %39 = vector.load %arg5[%c0_14, %c0_15, %c0_16] : memref<1x8x128xf32, #tpu.memory_space<vmem>>, vector<1x8x128xf32>
      %40 = vector.shape_cast %39 : vector<1x8x128xf32> to vector<8x128xf32>
      %41 = arith.addf %40, %34 : vector<8x128xf32>
      %c0_17 = arith.constant 0 : index
      %c0_18 = arith.constant 0 : index
      %c0_19 = arith.constant 0 : index
      %42 = vector.load %arg5[%c0_17, %c0_18, %c0_19] : memref<1x8x128xf32, #tpu.memory_space<vmem>>, vector<1x8x128xf32>
      %43 = vector.shape_cast %42 : vector<1x8x128xf32> to vector<8x128xf32>
      %44 = vector.shape_cast %41 : vector<8x128xf32> to vector<1x8x128xf32>
      tpu.vector_store %arg5[%c0_17, %c0_18, %c0_19], %44 {strides = array<i32>} : memref<1x8x128xf32, #tpu.memory_space<vmem>>, vector<1x8x128xf32>,
      %c0_20 = arith.constant 0 : index
      %c0_21 = arith.constant 0 : index
      %c0_22 = arith.constant 0 : index
      %45 = vector.load %arg6[%c0_20, %c0_21, %c0_22] : memref<1x8x128xf32, #tpu.memory_space<vmem>>, vector<1x8x128xf32>
      %46 = vector.shape_cast %45 : vector<1x8x128xf32> to vector<8x128xf32>
      %47 = arith.addf %46, %36 : vector<8x128xf32>
      %c0_23 = arith.constant 0 : index
      %c0_24 = arith.constant 0 : index
      %c0_25 = arith.constant 0 : index
      %48 = vector.load %arg6[%c0_23, %c0_24, %c0_25] : memref<1x8x128xf32, #tpu.memory_space<vmem>>, vector<1x8x128xf32>
      %49 = vector.shape_cast %48 : vector<1x8x128xf32> to vector<8x128xf32>
      %50 = vector.shape_cast %47 : vector<8x128xf32> to vector<1x8x128xf32>
      tpu.vector_store %arg6[%c0_23, %c0_24, %c0_25], %50 {strides = array<i32>} : memref<1x8x128xf32, #tpu.memory_space<vmem>>, vector<1x8x128xf32>,
      %c0_26 = arith.constant 0 : index
      %c0_27 = arith.constant 0 : index
      %c0_28 = arith.constant 0 : index
      %51 = vector.load %arg7[%c0_26, %c0_27, %c0_28] : memref<1x8x128xf32, #tpu.memory_space<vmem>>, vector<1x8x128xf32>
      %52 = vector.shape_cast %51 : vector<1x8x128xf32> to vector<8x128xf32>
      %53 = arith.addf %52, %38 : vector<8x128xf32>
      %c0_29 = arith.constant 0 : index
      %c0_30 = arith.constant 0 : index
      %c0_31 = arith.constant 0 : index
      %54 = vector.load %arg7[%c0_29, %c0_30, %c0_31] : memref<1x8x128xf32, #tpu.memory_space<vmem>>, vector<1x8x128xf32>
      %55 = vector.shape_cast %54 : vector<1x8x128xf32> to vector<8x128xf32>
      %56 = vector.shape_cast %53 : vector<8x128xf32> to vector<1x8x128xf32>
      tpu.vector_store %arg7[%c0_29, %c0_30, %c0_31], %56 {strides = array<i32>} : memref<1x8x128xf32, #tpu.memory_space<vmem>>, vector<1x8x128xf32>,
    } else {
    }
    %c256_i32_4 = arith.constant 256 : i32
    %10 = arith.cmpi slt, %6, %c256_i32_4 : i32
    %11 = arith.extui %10 : i1 to i32
    %c0_i32_5 = arith.constant 0 : i32
    %12 = arith.cmpi ne, %11, %c0_i32_5 : i32
    scf.if %12 {
      %cst = arith.constant 0.000000e+00 : f32
      %13 = vector.broadcast %cst : f32 to vector<8x128xf32>
      %c0_i32_6 = arith.constant 0 : i32
      %c256_i32_7 = arith.constant 256 : i32
      %14 = arith.muli %c0_i32_6, %c256_i32_7 : i32
      %15 = tpu.assume_multiple %14, 256 : i32
      %c0 = arith.constant 0 : index
      %16 = arith.index_cast %15 : i32 to index
      %17 = vector.load %arg3[%c0, %16] : memref<8x256xf32, #tpu.memory_space<vmem>>, vector<8x256xf32>
      %c0_8 = arith.constant 0 : index
      %18 = arith.index_cast %15 : i32 to index
      %19 = vector.load %arg4[%c0_8, %18] : memref<8x256xf32, #tpu.memory_space<vmem>>, vector<8x256xf32>
      %cst_9 = arith.constant 0.000000e+00 : f32
      %20 = vector.broadcast %cst_9 : f32 to vector<8x256xf32>
      %21 = arith.cmpf oge, %17, %20 : vector<8x256xf32>
      %22 = tpu.iota {dimensions = array<i32: 1>} : vector<8x256xi32>
      %23 = arith.subi %6, %15 : i32
      %24 = vector.broadcast %23 : i32 to vector<8x256xi32>
      %25 = arith.cmpi slt, %22, %24 : vector<8x256xi32>
      %26 = arith.andi %21, %25 : vector<8x256xi1>
      %cst_10 = arith.constant 0.000000e+00 : f32
      %27 = vector.broadcast %cst_10 : f32 to vector<8x256xf32>
      %28 = arith.select %25, %19, %27 : vector<8x256xi1>, vector<8x256xf32>
      %cst_11 = arith.constant 0.000000e+00 : f32
      %29 = vector.broadcast %cst_11 : f32 to vector<8x256xf32>
      %30 = arith.select %26, %28, %29 : vector<8x256xi1>, vector<8x256xf32>
      %cst_12 = arith.constant 1.000000e+00 : f32
      %cst_13 = arith.constant 0.000000e+00 : f32
      %31 = vector.broadcast %cst_12 : f32 to vector<8x256xf32>
      %32 = vector.broadcast %cst_13 : f32 to vector<8x256xf32>
      %33 = arith.select %26, %31, %32 : vector<8x256xi1>, vector<8x256xf32>
      %34 = vector.extract_strided_slice %30 {offsets = [0, 0], sizes = [8, 128], strides = [1, 1]} : vector<8x256xf32> to vector<8x128xf32>
      %35 = arith.addf %13, %34 : vector<8x128xf32>
      %36 = vector.extract_strided_slice %33 {offsets = [0, 0], sizes = [8, 128], strides = [1, 1]} : vector<8x256xf32> to vector<8x128xf32>
      %37 = arith.addf %13, %36 : vector<8x128xf32>
      %38 = vector.extract_strided_slice %28 {offsets = [0, 0], sizes = [8, 128], strides = [1, 1]} : vector<8x256xf32> to vector<8x128xf32>
      %39 = arith.addf %13, %38 : vector<8x128xf32>
      %40 = vector.extract_strided_slice %30 {offsets = [0, 128], sizes = [8, 128], strides = [1, 1]} : vector<8x256xf32> to vector<8x128xf32>
      %41 = arith.addf %35, %40 : vector<8x128xf32>
      %42 = vector.extract_strided_slice %33 {offsets = [0, 128], sizes = [8, 128], strides = [1, 1]} : vector<8x256xf32> to vector<8x128xf32>
      %43 = arith.addf %37, %42 : vector<8x128xf32>
      %44 = vector.extract_strided_slice %28 {offsets = [0, 128], sizes = [8, 128], strides = [1, 1]} : vector<8x256xf32> to vector<8x128xf32>
      %45 = arith.addf %39, %44 : vector<8x128xf32>
      %c1_i32_14 = arith.constant 1 : i32
      %c0_15 = arith.constant 0 : index
      %c0_16 = arith.constant 0 : index
      %c0_17 = arith.constant 0 : index
      %46 = vector.load %arg5[%c0_15, %c0_16, %c0_17] : memref<1x8x128xf32, #tpu.memory_space<vmem>>, vector<1x8x128xf32>
      %47 = vector.shape_cast %46 : vector<1x8x128xf32> to vector<8x128xf32>
      %48 = arith.addf %47, %41 : vector<8x128xf32>
      %c0_18 = arith.constant 0 : index
      %c0_19 = arith.constant 0 : index
      %c0_20 = arith.constant 0 : index
      %49 = vector.load %arg5[%c0_18, %c0_19, %c0_20] : memref<1x8x128xf32, #tpu.memory_space<vmem>>, vector<1x8x128xf32>
      %50 = vector.shape_cast %49 : vector<1x8x128xf32> to vector<8x128xf32>
      %51 = vector.shape_cast %48 : vector<8x128xf32> to vector<1x8x128xf32>
      tpu.vector_store %arg5[%c0_18, %c0_19, %c0_20], %51 {strides = array<i32>} : memref<1x8x128xf32, #tpu.memory_space<vmem>>, vector<1x8x128xf32>,
      %c0_21 = arith.constant 0 : index
      %c0_22 = arith.constant 0 : index
      %c0_23 = arith.constant 0 : index
      %52 = vector.load %arg6[%c0_21, %c0_22, %c0_23] : memref<1x8x128xf32, #tpu.memory_space<vmem>>, vector<1x8x128xf32>
      %53 = vector.shape_cast %52 : vector<1x8x128xf32> to vector<8x128xf32>
      %54 = arith.addf %53, %43 : vector<8x128xf32>
      %c0_24 = arith.constant 0 : index
      %c0_25 = arith.constant 0 : index
      %c0_26 = arith.constant 0 : index
      %55 = vector.load %arg6[%c0_24, %c0_25, %c0_26] : memref<1x8x128xf32, #tpu.memory_space<vmem>>, vector<1x8x128xf32>
      %56 = vector.shape_cast %55 : vector<1x8x128xf32> to vector<8x128xf32>
      %57 = vector.shape_cast %54 : vector<8x128xf32> to vector<1x8x128xf32>
      tpu.vector_store %arg6[%c0_24, %c0_25, %c0_26], %57 {strides = array<i32>} : memref<1x8x128xf32, #tpu.memory_space<vmem>>, vector<1x8x128xf32>,
      %c0_27 = arith.constant 0 : index
      %c0_28 = arith.constant 0 : index
      %c0_29 = arith.constant 0 : index
      %58 = vector.load %arg7[%c0_27, %c0_28, %c0_29] : memref<1x8x128xf32, #tpu.memory_space<vmem>>, vector<1x8x128xf32>
      %59 = vector.shape_cast %58 : vector<1x8x128xf32> to vector<8x128xf32>
      %60 = arith.addf %59, %45 : vector<8x128xf32>
      %c0_30 = arith.constant 0 : index
      %c0_31 = arith.constant 0 : index
      %c0_32 = arith.constant 0 : index
      %61 = vector.load %arg7[%c0_30, %c0_31, %c0_32] : memref<1x8x128xf32, #tpu.memory_space<vmem>>, vector<1x8x128xf32>
      %62 = vector.shape_cast %61 : vector<1x8x128xf32> to vector<8x128xf32>
      %63 = vector.shape_cast %60 : vector<8x128xf32> to vector<1x8x128xf32>
      tpu.vector_store %arg7[%c0_30, %c0_31, %c0_32], %63 {strides = array<i32>} : memref<1x8x128xf32, #tpu.memory_space<vmem>>, vector<1x8x128xf32>,
    } else {
    }
    return
  }
  func.func @transform_0(%arg0: i32, %arg1: i32, %arg2: i32) -> (i32, i32) {
    %c1_i32 = arith.constant 1 : i32
    %0 = arith.muli %arg1, %c1_i32 : i32
    %1 = arith.addi %0, %arg2 : i32
    %c0_i32 = arith.constant 0 : i32
    %2 = arith.minsi %1, %c0_i32 : i32
    %c0_i32_0 = arith.constant 0 : i32
    return %arg0, %2 : i32, i32
  }
  func.func @transform_1(%arg0: i32, %arg1: i32, %arg2: i32) -> (i32, i32) {
    %c1_i32 = arith.constant 1 : i32
    %0 = arith.muli %arg1, %c1_i32 : i32
    %1 = arith.addi %0, %arg2 : i32
    %c0_i32 = arith.constant 0 : i32
    %2 = arith.minsi %1, %c0_i32 : i32
    %c0_i32_0 = arith.constant 0 : i32
    return %arg0, %2 : i32, i32
  }
  func.func @transform_2(%arg0: i32, %arg1: i32, %arg2: i32) -> (i32, i32, i32) {
    %c0_i32 = arith.constant 0 : i32
    %c0_i32_0 = arith.constant 0 : i32
    return %arg1, %arg0, %c0_i32 : i32, i32, i32
  }
  func.func @transform_3(%arg0: i32, %arg1: i32, %arg2: i32) -> (i32, i32, i32) {
    %c0_i32 = arith.constant 0 : i32
    %c0_i32_0 = arith.constant 0 : i32
    return %arg1, %arg0, %c0_i32 : i32, i32, i32
  }
  func.func @transform_4(%arg0: i32, %arg1: i32, %arg2: i32) -> (i32, i32, i32) {
    %c0_i32 = arith.constant 0 : i32
    %c0_i32_0 = arith.constant 0 : i32
    return %arg1, %arg0, %c0_i32 : i32, i32, i32
  }
}

</mosaic_0001>

<bundles_post_ra>
// kernel: tpu_custom_call.1
= control target key start
LH: loop header
LB: loop body
LE: loop exit
PB: predicated region body
PF: predicated region fallthrough
CT: control target
= control target key end

     0   :  { %10 = vsyncpa [#allocation3], 0  ;;  %s415_s0 = inlined_call_operand.hbm [shape: f32[8,256], index: 0, kind: input, shape index: {}]   ;;  %s416_s1 = inlined_call_operand.hbm [shape: f32[8,256], index: 1, kind: input, shape index: {}]   ;;  %s417_s2 = inlined_call_operand.hbm [shape: f32[1,8,128], index: 2, kind: output, shape index: {0}]   ;;  %s418_s3 = inlined_call_operand.hbm [shape: f32[1,8,128], index: 3, kind: output, shape index: {1}]   ;;  %s419_s4 = inlined_call_operand.hbm [shape: f32[1,8,128], index: 4, kind: output, shape index: {2}]  }
   0x1   :  { %11 = vsyncpa [#allocation6], 0 }
   0x2   :  { %12 = vsyncpa [#allocation4], 0 }
   0x3   :  { %13 = vsyncpa [#allocation9], 0  ;;  %s310_s15 = smov [#allocation2]   ;;  %s311_s17 = smov [#allocation5]  }
   0x4   :  { %s26_s16 = sshll.u32 %s310_s15, 4  ;;  %s42_s18 = sshll.u32 %s311_s17, 4  ;;  %s27_s16 = int_to_ptr.vmem [resolvable:$true] %s26_s16  ;;  %s43_s18 = int_to_ptr.vmem [resolvable:$true] %s42_s18 }
   0x5   :  { %s192_s21 = scalar_lea.hbm %s415_s0, 256 }
   0x6   :  { %p193_p0 = scmp.ne.s32.totalorder %s415_s0, %s192_s21  ;;  %p196_p1 = scmp.lt.u32.totalorder %s192_s21, %s415_s0 }
   0x8   :  { %p198_p2 = pnand %p196_p1, %p193_p0 }
   0xa   :  { %201 = shalt.err (!%p198_p2)
}
   0xb   :  { %s202_s26 = scalar_lea.vmem %s27_s16, 256  ;;  %p207_p4 = scmp.lt.s32.totalorder %s27_s16, %s27_s16 }
   0xc   :  { %p203_p3 = scmp.ne.s32.totalorder %s27_s16, %s202_s26  ;;  %p208_p5 = scmp.lt.s32.totalorder %s202_s26, %s202_s26 }
   0xe   :  { %p209_p6 = por %p208_p5, %p207_p4 }
  0x10   :  { %p210_p7 = pnand %p209_p6, %p203_p3 }
  0x12   :  { %213 = shalt.err (!%p210_p7)
}
  0x13   :  { %29 = dma.hbm_to_vmem [thread:$0]  %s415_s0, 256, %s27_s16, [#allocation3]  }
  0x14   :  { %s214_s5 = scalar_lea.hbm %s416_s1, 256 }
  0x15   :  { %p215_p8 = scmp.ne.s32.totalorder %s416_s1, %s214_s5  ;;  %p218_p9 = scmp.lt.u32.totalorder %s214_s5, %s416_s1 }
  0x17   :  { %p220_p10 = pnand %p218_p9, %p215_p8 }
  0x19   :  { %223 = shalt.err (!%p220_p10)
}
  0x1a   :  { %s224_s10 = scalar_lea.vmem %s43_s18, 256  ;;  %p229_p12 = scmp.lt.s32.totalorder %s43_s18, %s43_s18 }
  0x1b   :  { %p225_p11 = scmp.ne.s32.totalorder %s43_s18, %s224_s10  ;;  %p230_p13 = scmp.lt.s32.totalorder %s224_s10, %s224_s10 }
  0x1d   :  { %p231_p0 = por %p230_p13, %p229_p12 }
  0x1f   :  { %p232_p1 = pnand %p231_p0, %p225_p11 }
  0x21   :  { %235 = shalt.err (!%p232_p1)
}
  0x22   :  { %45 = dma.hbm_to_vmem [thread:$0]  %s416_s1, 256, %s43_s18, [#allocation6]  }
  0x23   :  { %302 = dma.done.wait [#allocation3], 256  }
  0x24   :  { %303 = vsyncadd [#allocation3], 4294967040 }
  0x25   :  { %304 = dma.done.wait [#allocation6], 256  }
  0x26   :  { %305 = vsyncadd [#allocation6], 4294967040  ;;  %v74_v0 = vld [vmem:[#allocation2] sm:$0xff]  ;;  %v75_v1 = vld [vmem:[#allocation2 + $0x8] sm:$0xff]  ;;  %v312_v4 = vmov 0.0   ;;  %s313_s12 = smov [#allocation8]  }
  0x27   :  { %v76_v2 = vld [vmem:[#allocation5] sm:$0xff]  ;;  %vm78_vm0 = vcmp.ge.f32.partialorder %v74_v0, 0.0  ;;  %vm79_vm1 = vcmp.ge.f32.partialorder %v75_v1, 0.0  ;;  %v77_v3 = vld [vmem:[#allocation5 + $0x8] sm:$0xff]  ;;  %s155_s13 = sshll.u32 %s313_s12, 4  ;;  %s314_s1 = smov [#allocation7]   ;;  %s156_s13 = int_to_ptr.vmem [resolvable:$true] %s155_s13 }
  0x28   :  { %v82_v5 = vsel %vm78_vm0, 1.0, %v312_v4  ;;  %v83_v6 = vsel %vm79_vm1, 1.0, %v312_v4  ;;  %v80_v7 = vsel %vm78_vm0, %v76_v2, 0.0  ;;  %v81_v8 = vsel %vm79_vm1, %v77_v3, 0.0  ;;  %s145_s14 = sshll.u32 %s314_s1, 4  ;;  %s315_s15 = smov [#allocation10]   ;;  %s365_s14 = int_to_ptr.vmem [resolvable:$true] %s145_s14 }
  0x29   :  { %v88_v9 = vadd.f32 %v83_v6, %v82_v5  ;;  %v87_v10 = vadd.f32 %v81_v8, %v80_v7  ;;  %v89_v11 = vadd.f32 %v77_v3, %v76_v2  ;;  %s165_s16 = sshll.u32 %s315_s15, 4  ;;  %s236_s17 = scalar_lea.vmem %s156_s13, 128  ;;  %s367_s16 = int_to_ptr.vmem [resolvable:$true] %s165_s16 }
  0x2a   :  { %p237_p2 = scmp.ne.s32.totalorder %s156_s13, %s236_s17  ;;  %p241_p3 = scmp.lt.s32.totalorder %s156_s13, %s156_s13 }
  0x2b   :  { %95 = vst [vmem:[#allocation8] sm:$0xff] %v88_v9  ;;  %92 = vst [vmem:[#allocation7] sm:$0xff] %v87_v10  ;;  %p242_p4 = scmp.lt.s32.totalorder %s236_s17, %s236_s17 }
  0x2c   :  { %98 = vst [vmem:[#allocation10] sm:$0xff] %v89_v11 }
  0x2d   :  { %p243_p5 = por %p242_p4, %p241_p3 }
  0x2f   :  { %p244_p6 = pnand %p243_p5, %p237_p2 }
  0x31   :  { %247 = shalt.err (!%p244_p6)
}
  0x32   :  { %s248_s20 = scalar_lea.hbm %s418_s3, 128 }
  0x33   :  { %p249_p7 = scmp.ne.s32.totalorder %s418_s3, %s248_s20  ;;  %p252_p8 = scmp.lt.u32.totalorder %s248_s20, %s418_s3 }
  0x35   :  { %p254_p9 = pnand %p252_p8, %p249_p7 }
  0x37   :  { %257 = shalt.err (!%p254_p9)
}
  0x38   :  { %158 = dma.vmem_to_hbm [thread:$0]  %s156_s13, 128, %s418_s3, [#allocation9]  }
  0x39   :  { %s258_s27 = scalar_lea.vmem %s365_s14, 128  ;;  %p263_p11 = scmp.lt.s32.totalorder %s365_s14, %s365_s14 }
  0x3a   :  { %p259_p10 = scmp.ne.s32.totalorder %s365_s14, %s258_s27  ;;  %p264_p12 = scmp.lt.s32.totalorder %s258_s27, %s258_s27 }
  0x3c   :  { %p265_p13 = por %p264_p12, %p263_p11 }
  0x3e   :  { %p266_p0 = pnand %p265_p13, %p259_p10 }
  0x40   :  { %269 = shalt.err (!%p266_p0)
}
  0x41   :  { %s270_s30 = scalar_lea.hbm %s417_s2, 128 }
  0x42   :  { %p271_p1 = scmp.ne.s32.totalorder %s417_s2, %s270_s30  ;;  %p274_p2 = scmp.lt.u32.totalorder %s270_s30, %s417_s2 }
  0x44   :  { %p276_p3 = pnand %p274_p2, %p271_p1 }
  0x46   :  { %279 = shalt.err (!%p276_p3)
}
  0x47   :  { %148 = dma.vmem_to_hbm [thread:$0]  %s365_s14, 128, %s417_s2, [#allocation4]  }
  0x48   :  { %s280_s10 = scalar_lea.vmem %s367_s16, 128  ;;  %p285_p5 = scmp.lt.s32.totalorder %s367_s16, %s367_s16 }
  0x49   :  { %p281_p4 = scmp.ne.s32.totalorder %s367_s16, %s280_s10  ;;  %p286_p6 = scmp.lt.s32.totalorder %s280_s10, %s280_s10 }
  0x4b   :  { %p287_p7 = por %p286_p6, %p285_p5 }
  0x4d   :  { %p288_p8 = pnand %p287_p7, %p281_p4 }
  0x4f   :  { %291 = shalt.err (!%p288_p8)
}
  0x50   :  { %s292_s12 = scalar_lea.hbm %s419_s4, 128 }
  0x51   :  { %p293_p9 = scmp.ne.s32.totalorder %s419_s4, %s292_s12  ;;  %p296_p10 = scmp.lt.u32.totalorder %s292_s12, %s419_s4 }
  0x53   :  { %p298_p11 = pnand %p296_p10, %p293_p9 }
  0x55   :  { %301 = shalt.err (!%p298_p11)
}
  0x56   :  { %168 = dma.vmem_to_hbm [thread:$0]  %s367_s16, 128, %s419_s4, [#allocation9]  }
  0x57   :  { %306 = dma.done.wait [#allocation4], 128  }
  0x58   :  { %307 = vsyncadd [#allocation4], 4294967168 }
  0x59   :  { %308 = dma.done.wait [#allocation9], 256  }
  0x5a   :  { %309 = vsyncadd [#allocation9], 4294967040 }
  0x5b   :  { %178 = vsyncpa [#allocation3], 1 }
  0x5c   :  { %179 = vsyncpa [#allocation6], 1 }
  0x5d   :  { %180 = vsyncpa [#allocation4], 1 }
  0x5e   :  { %181 = vsyncpa [#allocation9], 1 }

</bundles_post_ra>
